<compile_context>
chip_gen: v5e
topology: v5e:2x2
jax: 0.10.0
libtpu: 0.0.40
codegen_flags: <defaults>
</compile_context>

<pallas_src>
import functools

import numpy as np
import jax
import jax.numpy as jnp
from jax import lax
from jax.experimental import pallas as pl
from jax.experimental.pallas import tpu as pltpu


def _rpn_head_kernel(x_ref, halo_ref, mask_ref, wconv_ref, bconv_ref, whead_ref,
                     bhead_ref, box_ref, cls_ref, xp_ref, *, TH, W, C, A, cdt):
    """One grid step == TH output rows of one image.

    x_ref    : (1, C, TH*W)      interior rows of the tile (pixels on lanes)
    halo_ref : (1, 1, 2, C, W)   row above / row below the tile (zeros at image borders)
    mask_ref : (2, 1, S)         column-validity masks for the col-1 / col+1 variants
    wconv_ref: (9, C, C)         3x3 conv weights, tap index t = 3*dy + dx
    bconv_ref: (C, 1)            f32
    whead_ref: (5A, C)           fused [bbox_pred ; cls_logits] 1x1 conv weights
    bhead_ref: (5A, 1)           f32
    box_ref  : (1, 4A, TH*W)
    cls_ref  : (1, A, TH*W)
    xp_ref   : (C, S + 2)        persistent scratch: [zero][halo-padded slab][zero]
    """
    L = TH * W
    S = (TH + 2) * W

    # Assemble the halo-padded slab in the matmul operand dtype (bf16 by default).
    halo = halo_ref[...]
    xp_ref[:, 0:1] = jnp.zeros((C, 1), cdt)
    xp_ref[:, 1:W + 1] = halo[0, 0, 0].astype(cdt)             # row above the tile
    xp_ref[:, W + 1:W + 1 + L] = x_ref[0].astype(cdt)          # TH interior rows
    xp_ref[:, W + 1 + L:S + 1] = halo[0, 0, 1].astype(cdt)     # row below the tile
    xp_ref[:, S + 1:S + 2] = jnp.zeros((C, 1), cdt)

    # Three column variants: value at col-1 / col / col+1 for every slab pixel.
    # Only the two shifted variants need a (0/1, exact) mask that kills the
    # row-to-row wraparound of the flattened layout.
    c0 = xp_ref[:, 0:S] * mask_ref[0]
    c1 = xp_ref[:, 1:S + 1]
    c2 = xp_ref[:, 2:S + 2] * mask_ref[1]
    cols = (c0, c1, c2)

    # 3x3 conv == 9 accumulated (C, C) x (C, L) MXU matmuls, f32 accumulator
    # (no im2col slab).  Tap (dy, dx) is a static row-offset slice of a variant.
    acc = jnp.zeros((C, L), jnp.float32)
    for dy in range(3):
        for dx in range(3):
            tap = cols[dx][:, dy * W:dy * W + L]
            acc = acc + jnp.dot(wconv_ref[3 * dy + dx], tap,
                                preferred_element_type=jnp.float32)
    t = jnp.maximum(acc + bconv_ref[...], 0.0)                 # bias + ReLU in f32

    # Fused 1x1 heads: one (5A, C) x (C, L) matmul.  Ordered [bbox(4A) ; cls(A)] so the
    # larger slab starts at sublane 0 and the cls slab starts at a multiple of 8.
    head = jnp.dot(whead_ref[...], t.astype(cdt),
                   preferred_element_type=jnp.float32) + bhead_ref[...]
    box_ref[0] = head[:4 * A, :].astype(box_ref.dtype)
    cls_ref[0] = head[4 * A:, :].astype(cls_ref.dtype)


def _column_masks(S, W):
    """Static 0/1 masks over slab positions for the col-1 / col+1 variants."""
    w = np.arange(S, dtype=np.int64) % W
    m_left = (w >= 1).astype(np.float32)        # (col - 1) exists
    m_right = (w <= W - 2).astype(np.float32)   # (col + 1) exists
    return np.stack([m_left, m_right], axis=0).reshape(2, 1, S)


def _choose_row_tile(H, W, C, itemsize, slab_budget_bytes=2 << 20):
    """Largest TH dividing H whose output block is lane-aligned (TH*W % 128 == 0)
    and whose halo-padded slab fits the budget; else whole-image fallback."""
    cand = [th for th in range(1, H + 1)
            if H % th == 0 and (th * W) % 128 == 0
            and (th + 2) * W * C * itemsize <= slab_budget_bytes]
    return max(cand) if cand else H


def prepare_params(torch_params, compute_dtype=jnp.bfloat16):
    """PyTorch-layout params -> kernel-layout params (matmul operands in compute_dtype).

    torch_params = (wconv_oihw (C,C,3,3), bconv (C,), wcls_oihw (A,C,1,1), bcls (A,),
                    wbox_oihw (4A,C,1,1), bbox (4A,))
    """
    wconv_oihw, bconv, wcls_oihw, bcls, wbox_oihw, bbox = torch_params
    C = wconv_oihw.shape[0]
    A = wcls_oihw.shape[0]
    # (Cout, Cin, ky, kx) -> (ky, kx, Cout, Cin) -> (9, Cout, Cin); tap t = 3*dy + dx.
    wconv = jnp.transpose(wconv_oihw, (2, 3, 0, 1)).reshape(9, C, C).astype(compute_dtype)
    bconv_k = bconv.reshape(C, 1).astype(jnp.float32)
    # Fused heads ordered [bbox_pred ; cls_logits] (sublane-aligned output slabs).
    whead = jnp.concatenate([wbox_oihw[:, :, 0, 0], wcls_oihw[:, :, 0, 0]],
                            axis=0).astype(compute_dtype)
    bhead = jnp.concatenate([bbox.reshape(-1), bcls.reshape(-1)]
                            ).reshape(5 * A, 1).astype(jnp.float32)
    return (wconv, bconv_k, whead, bhead, A)


def rpn_head_single(x_nchw, kernel_params, row_tile=None):
    """Apply RPNHead to one NCHW feature map. Returns (objectness, bbox_pred) in NCHW."""
    wconv, bconv, whead, bhead, A = kernel_params
    cdt = wconv.dtype                                    # matmul operand dtype
    N, C, H, W = x_nchw.shape
    P = H * W

    TH = (_choose_row_tile(H, W, C, jnp.dtype(cdt).itemsize)
          if row_tile is None else row_tile)
    assert H % TH == 0, (H, TH)
    assert TH == H or (TH * W) % 128 == 0, (TH, W)       # lane-aligned blocks
    R = H // TH
    L = TH * W
    S = (TH + 2) * W

    x_flat = x_nchw.reshape(N, C, P)                     # free reshape (pixels on lanes)

    # Per-tile halo rows: row r*TH-1 (above) and row (r+1)*TH (below), zeros at the
    # image borders.  Tiny side array so every kernel block is a plain BlockSpec DMA.
    zrow = jnp.zeros((N, C, 1, W), x_nchw.dtype)
    above = jnp.concatenate([zrow, x_nchw[:, :, :H - 1, :]], axis=2)
    below = jnp.concatenate([x_nchw[:, :, 1:, :], zrow], axis=2)
    halo_top = above[:, :, ::TH, :]                      # (N, C, R, W)
    halo_bot = below[:, :, TH - 1::TH, :]                # (N, C, R, W)
    halos = jnp.stack([halo_top, halo_bot], axis=2)      # (N, C, 2, R, W)
    halos = jnp.transpose(halos, (0, 3, 2, 1, 4))        # (N, R, 2, C, W)   (small)

    masks = jnp.asarray(_column_masks(S, W), dtype=cdt)  # (2, 1, S) static 0/1

    kernel = functools.partial(_rpn_head_kernel, TH=TH, W=W, C=C, A=A, cdt=cdt)

    def const(a):
        nd = a.ndim
        return pl.BlockSpec(a.shape, lambda n, r: (0,) * nd)

    itemsize = x_nchw.dtype.itemsize
    flops = 2 * N * P * (9 * C * C + 5 * A * C)
    bytes_accessed = int(itemsize * (x_flat.size + halos.size + N * P * 5 * A)
                         + jnp.dtype(cdt).itemsize * (masks.size + wconv.size + whead.size)
                         + 4 * (bconv.size + bhead.size))

    box_flat, cls_flat = pl.pallas_call(
        kernel,
        out_shape=(jax.ShapeDtypeStruct((N, 4 * A, P), x_nchw.dtype),
                   jax.ShapeDtypeStruct((N, A, P), x_nchw.dtype)),
        grid_spec=pltpu.PrefetchScalarGridSpec(
            num_scalar_prefetch=0,
            grid=(N, R),
            in_specs=[
                pl.BlockSpec((1, C, L), lambda n, r: (n, 0, r)),
                pl.BlockSpec((1, 1, 2, C, W), lambda n, r: (n, r, 0, 0, 0)),
                const(masks),
                const(wconv),
                const(bconv),
                const(whead),
                const(bhead),
            ],
            out_specs=[
                pl.BlockSpec((1, 4 * A, L), lambda n, r: (n, 0, r)),
                pl.BlockSpec((1, A, L), lambda n, r: (n, 0, r)),
            ],
            scratch_shapes=[pltpu.VMEM((C, S + 2), cdt)],
        ),
        compiler_params=pltpu.CompilerParams(
            dimension_semantics=("parallel", "parallel"),
            vmem_limit_bytes=48 * 1024 * 1024),
        cost_estimate=pl.CostEstimate(flops=flops, transcendentals=0,
                                      bytes_accessed=bytes_accessed),
    )(x_flat, halos, masks, wconv, bconv, whead, bhead)

    # Free reshapes back to NCHW (no output transposes).
    return cls_flat.reshape(N, A, H, W), box_flat.reshape(N, 4 * A, H, W)


def rpn_head(features, kernel_params, row_tiles=None):
    """features: list of NCHW arrays. Returns (objectness list, bbox regression list)."""
    if row_tiles is None:
        row_tiles = [None] * len(features)
    objectness, rpn_box_regression = [], []
    for f, rt in zip(features, row_tiles):
        cls, box = rpn_head_single(f, kernel_params, row_tile=rt)
        objectness.append(cls)
        rpn_box_regression.append(box)
    return objectness, rpn_box_regression


def init_params(key, in_channels, num_anchors, dtype=jnp.float32):
    """Deterministic synthetic params in the PyTorch module's layouts."""
    C, A = in_channels, num_anchors
    k = jax.random.split(key, 6)
    wconv_oihw = jax.random.normal(k[0], (C, C, 3, 3), dtype) * 0.05
    bconv = jax.random.normal(k[1], (C,), dtype) * 0.05
    wcls_oihw = jax.random.normal(k[2], (A, C, 1, 1), dtype) * 0.05
    bcls = jax.random.normal(k[3], (A,), dtype) * 0.05
    wbox_oihw = jax.random.normal(k[4], (4 * A, C, 1, 1), dtype) * 0.05
    bbox = jax.random.normal(k[5], (4 * A,), dtype) * 0.05
    return (wconv_oihw, bconv, wcls_oihw, bcls, wbox_oihw, bbox)


def _reference(features, torch_params):
    """Pure-JAX (lax.conv) reference of the PyTorch forward, NCHW in/out."""
    wconv_oihw, bconv, wcls_oihw, bcls, wbox_oihw, bbox = torch_params
    dn = lax.conv_dimension_numbers(features[0].shape, wconv_oihw.shape,
                                    ('NCHW', 'OIHW', 'NCHW'))
    outs_cls, outs_box = [], []
    for f in features:
        t = lax.conv_general_dilated(f, wconv_oihw, (1, 1), ((1, 1), (1, 1)),
                                     dimension_numbers=dn)
        t = jnp.maximum(t + bconv.reshape(1, -1, 1, 1), 0.0)
        c = lax.conv_general_dilated(t, wcls_oihw, (1, 1), 'VALID',
                                     dimension_numbers=dn) + bcls.reshape(1, -1, 1, 1)
        b = lax.conv_general_dilated(t, wbox_oihw, (1, 1), 'VALID',
                                     dimension_numbers=dn) + bbox.reshape(1, -1, 1, 1)
        outs_cls.append(c)
        outs_box.append(b)
    return outs_cls, outs_box


if __name__ == "__main__":
    key = jax.random.PRNGKey(0)
    in_channels, num_anchors = 8, 4
    torch_params = init_params(jax.random.fold_in(key, 1), in_channels, num_anchors)

    # Two feature levels (like an FPN), small NCHW shapes.
    f0 = jax.random.normal(jax.random.fold_in(key, 2), (2, in_channels, 16, 16), jnp.float32)
    f1 = jax.random.normal(jax.random.fold_in(key, 3), (2, in_channels, 8, 8), jnp.float32)
    features = [f0, f1]
    # 16x16: two 8-row tiles (exercises the interior halo path); 8x8: whole-image fallback.
    row_tiles = [8, None]

    ref_cls, ref_box = _reference(features, torch_params)

    # f32 compute path: strict check of the tiling / halo / mask logic.
    params_f32 = prepare_params(torch_params, compute_dtype=jnp.float32)
    cls32, box32 = rpn_head(features, params_f32, row_tiles)
    jax.block_until_ready(cls32)
    jax.block_until_ready(box32)
    for got, ref in zip(cls32 + box32, ref_cls + ref_box):
        assert got.shape == ref.shape, (got.shape, ref.shape)
        assert float(jnp.max(jnp.abs(got - ref))) < 1e-4

    # bf16 compute path (the production config: bf16 MXU operands, f32 accumulation).
    params_bf16 = prepare_params(torch_params, compute_dtype=jnp.bfloat16)
    cls16, box16 = rpn_head(features, params_bf16, row_tiles)
    jax.block_until_ready(cls16)
    jax.block_until_ready(box16)
    for got, ref in zip(cls16 + box16, ref_cls + ref_box):
        assert got.shape == ref.shape, (got.shape, ref.shape)
        assert float(jnp.max(jnp.abs(got - ref))) < 2e-2

    print("KERNEL_OK")
</pallas_src>

<mosaic_0001>
module attributes {stable_mosaic.version = 11 : i64} {
  func.func @_rpn_head_kernel(%arg0: i32, %arg1: i32, %arg2: memref<1x8x128xf32, #tpu.memory_space<vmem>>, %arg3: memref<1x1x2x8x16xf32, #tpu.memory_space<vmem>>, %arg4: memref<2x1x160xf32, #tpu.memory_space<vmem>>, %arg5: memref<9x8x8xf32, #tpu.memory_space<vmem>>, %arg6: memref<8x1xf32, #tpu.memory_space<vmem>>, %arg7: memref<20x8xf32, #tpu.memory_space<vmem>>, %arg8: memref<20x1xf32, #tpu.memory_space<vmem>>, %arg9: memref<1x16x128xf32, #tpu.memory_space<vmem>>, %arg10: memref<1x4x128xf32, #tpu.memory_space<vmem>>, %arg11: memref<8x162xf32, #tpu.memory_space<vmem>>) attributes {dimension_semantics = [#tpu.dimension_semantics<parallel>, #tpu.dimension_semantics<parallel>], iteration_bounds = array<i64: 2, 2>, scalar_prefetch = 0 : i64, scratch_operands = 1 : i64, tpu.core_type = #tpu.core_type<tc>, window_params = [{transform_indices = @transform_0, window_bounds = array<i64: 1, 8, 128>}, {transform_indices = @transform_1, window_bounds = array<i64: 1, 1, 2, 8, 16>}, {pipeline_mode = #tpu.pipeline_mode<synchronous>, transform_indices = @transform_2, window_bounds = array<i64: 2, 1, 160>}, {pipeline_mode = #tpu.pipeline_mode<synchronous>, transform_indices = @transform_3, window_bounds = array<i64: 9, 8, 8>}, {pipeline_mode = #tpu.pipeline_mode<synchronous>, transform_indices = @transform_4, window_bounds = array<i64: 8, 1>}, {pipeline_mode = #tpu.pipeline_mode<synchronous>, transform_indices = @transform_5, window_bounds = array<i64: 20, 8>}, {pipeline_mode = #tpu.pipeline_mode<synchronous>, transform_indices = @transform_6, window_bounds = array<i64: 20, 1>}, {transform_indices = @transform_7, window_bounds = array<i64: 1, 16, 128>}, {transform_indices = @transform_8, window_bounds = array<i64: 1, 4, 128>}]} {
    %c0 = arith.constant 0 : index
    %c0_0 = arith.constant 0 : index
    %c0_1 = arith.constant 0 : index
    %c0_2 = arith.constant 0 : index
    %c0_3 = arith.constant 0 : index
    %0 = vector.load %arg3[%c0, %c0_0, %c0_1, %c0_2, %c0_3] : memref<1x1x2x8x16xf32, #tpu.memory_space<vmem>>, vector<1x1x2x8x16xf32>
    %cst = arith.constant 0.000000e+00 : f32
    %1 = vector.broadcast %cst : f32 to vector<8x1xf32>
    %c0_4 = arith.constant 0 : index
    %c0_5 = arith.constant 0 : index
    %2 = vector.load %arg11[%c0_4, %c0_5] : memref<8x162xf32, #tpu.memory_space<vmem>>, vector<8x1xf32>
    tpu.vector_store %arg11[%c0_4, %c0_5], %1 {strides = array<i32>} : memref<8x162xf32, #tpu.memory_space<vmem>>, vector<8x1xf32>,
    %3 = vector.extract_strided_slice %0 {offsets = [0, 0, 0, 0, 0], sizes = [1, 1, 1, 8, 16], strides = [1, 1, 1, 1, 1]} : vector<1x1x2x8x16xf32> to vector<1x1x1x8x16xf32>
    %4 = vector.shape_cast %3 : vector<1x1x1x8x16xf32> to vector<8x16xf32>
    %c0_6 = arith.constant 0 : index
    %c1 = arith.constant 1 : index
    %5 = vector.load %arg11[%c0_6, %c1] : memref<8x162xf32, #tpu.memory_space<vmem>>, vector<8x16xf32>
    tpu.vector_store %arg11[%c0_6, %c1], %4 {strides = array<i32>} : memref<8x162xf32, #tpu.memory_space<vmem>>, vector<8x16xf32>,
    %c0_7 = arith.constant 0 : index
    %c0_8 = arith.constant 0 : index
    %c0_9 = arith.constant 0 : index
    %6 = vector.load %arg2[%c0_7, %c0_8, %c0_9] : memref<1x8x128xf32, #tpu.memory_space<vmem>>, vector<1x8x128xf32>
    %7 = vector.shape_cast %6 : vector<1x8x128xf32> to vector<8x128xf32>
    %c0_10 = arith.constant 0 : index
    %c17 = arith.constant 17 : index
    %8 = vector.load %arg11[%c0_10, %c17] : memref<8x162xf32, #tpu.memory_space<vmem>>, vector<8x128xf32>
    tpu.vector_store %arg11[%c0_10, %c17], %7 {strides = array<i32>} : memref<8x162xf32, #tpu.memory_space<vmem>>, vector<8x128xf32>,
    %9 = vector.extract_strided_slice %0 {offsets = [0, 0, 1, 0, 0], sizes = [1, 1, 1, 8, 16], strides = [1, 1, 1, 1, 1]} : vector<1x1x2x8x16xf32> to vector<1x1x1x8x16xf32>
    %10 = vector.shape_cast %9 : vector<1x1x1x8x16xf32> to vector<8x16xf32>
    %c0_11 = arith.constant 0 : index
    %c145 = arith.constant 145 : index
    %11 = vector.load %arg11[%c0_11, %c145] : memref<8x162xf32, #tpu.memory_space<vmem>>, vector<8x16xf32>
    tpu.vector_store %arg11[%c0_11, %c145], %10 {strides = array<i32>} : memref<8x162xf32, #tpu.memory_space<vmem>>, vector<8x16xf32>,
    %cst_12 = arith.constant 0.000000e+00 : f32
    %12 = vector.broadcast %cst_12 : f32 to vector<8x1xf32>
    %c0_13 = arith.constant 0 : index
    %c161 = arith.constant 161 : index
    %13 = vector.load %arg11[%c0_13, %c161] : memref<8x162xf32, #tpu.memory_space<vmem>>, vector<8x1xf32>
    tpu.vector_store %arg11[%c0_13, %c161], %12 {strides = array<i32>} : memref<8x162xf32, #tpu.memory_space<vmem>>, vector<8x1xf32>,
    %c0_14 = arith.constant 0 : index
    %c0_15 = arith.constant 0 : index
    %14 = vector.load %arg11[%c0_14, %c0_15] : memref<8x162xf32, #tpu.memory_space<vmem>>, vector<8x160xf32>
    %c0_16 = arith.constant 0 : index
    %c0_17 = arith.constant 0 : index
    %c0_18 = arith.constant 0 : index
    %15 = vector.load %arg4[%c0_16, %c0_17, %c0_18] : memref<2x1x160xf32, #tpu.memory_space<vmem>>, vector<1x1x160xf32>
    %16 = vector.shape_cast %15 : vector<1x1x160xf32> to vector<1x160xf32>
    %17 = vector.broadcast %16 : vector<1x160xf32> to vector<8x160xf32>
    %18 = arith.mulf %14, %17 : vector<8x160xf32>
    %c0_19 = arith.constant 0 : index
    %c1_20 = arith.constant 1 : index
    %19 = vector.load %arg11[%c0_19, %c1_20] : memref<8x162xf32, #tpu.memory_space<vmem>>, vector<8x160xf32>
    %c0_21 = arith.constant 0 : index
    %c2 = arith.constant 2 : index
    %20 = vector.load %arg11[%c0_21, %c2] : memref<8x162xf32, #tpu.memory_space<vmem>>, vector<8x160xf32>
    %c1_22 = arith.constant 1 : index
    %c0_23 = arith.constant 0 : index
    %c0_24 = arith.constant 0 : index
    %21 = vector.load %arg4[%c1_22, %c0_23, %c0_24] : memref<2x1x160xf32, #tpu.memory_space<vmem>>, vector<1x1x160xf32>
    %22 = vector.shape_cast %21 : vector<1x1x160xf32> to vector<1x160xf32>
    %23 = vector.broadcast %22 : vector<1x160xf32> to vector<8x160xf32>
    %24 = arith.mulf %20, %23 : vector<8x160xf32>
    %cst_25 = arith.constant 0.000000e+00 : f32
    %25 = vector.broadcast %cst_25 : f32 to vector<8x128xf32>
    %26 = vector.extract_strided_slice %18 {offsets = [0, 0], sizes = [8, 128], strides = [1, 1]} : vector<8x160xf32> to vector<8x128xf32>
    %c0_26 = arith.constant 0 : index
    %c0_27 = arith.constant 0 : index
    %c0_28 = arith.constant 0 : index
    %27 = vector.load %arg5[%c0_26, %c0_27, %c0_28] : memref<9x8x8xf32, #tpu.memory_space<vmem>>, vector<1x8x8xf32>
    %28 = vector.shape_cast %27 : vector<1x8x8xf32> to vector<8x8xf32>
    %cst_29 = arith.constant dense<0.000000e+00> : vector<8x128xf32>
    %29 = tpu.matmul %28, %26, %cst_29 {dimension_numbers = #tpu.dot_dimension_numbers<[1], [0], [0], [1], [0, 0, 1, 1], [], []>} : vector<8x8xf32>, vector<8x128xf32>, vector<8x128xf32> -> vector<8x128xf32>
    %30 = arith.addf %25, %29 : vector<8x128xf32>
    %31 = vector.extract_strided_slice %19 {offsets = [0, 0], sizes = [8, 128], strides = [1, 1]} : vector<8x160xf32> to vector<8x128xf32>
    %c1_30 = arith.constant 1 : index
    %c0_31 = arith.constant 0 : index
    %c0_32 = arith.constant 0 : index
    %32 = vector.load %arg5[%c1_30, %c0_31, %c0_32] : memref<9x8x8xf32, #tpu.memory_space<vmem>>, vector<1x8x8xf32>
    %33 = vector.shape_cast %32 : vector<1x8x8xf32> to vector<8x8xf32>
    %cst_33 = arith.constant dense<0.000000e+00> : vector<8x128xf32>
    %34 = tpu.matmul %33, %31, %cst_33 {dimension_numbers = #tpu.dot_dimension_numbers<[1], [0], [0], [1], [0, 0, 1, 1], [], []>} : vector<8x8xf32>, vector<8x128xf32>, vector<8x128xf32> -> vector<8x128xf32>
    %35 = arith.addf %30, %34 : vector<8x128xf32>
    %36 = vector.extract_strided_slice %24 {offsets = [0, 0], sizes = [8, 128], strides = [1, 1]} : vector<8x160xf32> to vector<8x128xf32>
    %c2_34 = arith.constant 2 : index
    %c0_35 = arith.constant 0 : index
    %c0_36 = arith.constant 0 : index
    %37 = vector.load %arg5[%c2_34, %c0_35, %c0_36] : memref<9x8x8xf32, #tpu.memory_space<vmem>>, vector<1x8x8xf32>
    %38 = vector.shape_cast %37 : vector<1x8x8xf32> to vector<8x8xf32>
    %cst_37 = arith.constant dense<0.000000e+00> : vector<8x128xf32>
    %39 = tpu.matmul %38, %36, %cst_37 {dimension_numbers = #tpu.dot_dimension_numbers<[1], [0], [0], [1], [0, 0, 1, 1], [], []>} : vector<8x8xf32>, vector<8x128xf32>, vector<8x128xf32> -> vector<8x128xf32>
    %40 = arith.addf %35, %39 : vector<8x128xf32>
    %41 = vector.extract_strided_slice %18 {offsets = [0, 16], sizes = [8, 128], strides = [1, 1]} : vector<8x160xf32> to vector<8x128xf32>
    %c3 = arith.constant 3 : index
    %c0_38 = arith.constant 0 : index
    %c0_39 = arith.constant 0 : index
    %42 = vector.load %arg5[%c3, %c0_38, %c0_39] : memref<9x8x8xf32, #tpu.memory_space<vmem>>, vector<1x8x8xf32>
    %43 = vector.shape_cast %42 : vector<1x8x8xf32> to vector<8x8xf32>
    %cst_40 = arith.constant dense<0.000000e+00> : vector<8x128xf32>
    %44 = tpu.matmul %43, %41, %cst_40 {dimension_numbers = #tpu.dot_dimension_numbers<[1], [0], [0], [1], [0, 0, 1, 1], [], []>} : vector<8x8xf32>, vector<8x128xf32>, vector<8x128xf32> -> vector<8x128xf32>
    %45 = arith.addf %40, %44 : vector<8x128xf32>
    %46 = vector.extract_strided_slice %19 {offsets = [0, 16], sizes = [8, 128], strides = [1, 1]} : vector<8x160xf32> to vector<8x128xf32>
    %c4 = arith.constant 4 : index
    %c0_41 = arith.constant 0 : index
    %c0_42 = arith.constant 0 : index
    %47 = vector.load %arg5[%c4, %c0_41, %c0_42] : memref<9x8x8xf32, #tpu.memory_space<vmem>>, vector<1x8x8xf32>
    %48 = vector.shape_cast %47 : vector<1x8x8xf32> to vector<8x8xf32>
    %cst_43 = arith.constant dense<0.000000e+00> : vector<8x128xf32>
    %49 = tpu.matmul %48, %46, %cst_43 {dimension_numbers = #tpu.dot_dimension_numbers<[1], [0], [0], [1], [0, 0, 1, 1], [], []>} : vector<8x8xf32>, vector<8x128xf32>, vector<8x128xf32> -> vector<8x128xf32>
    %50 = arith.addf %45, %49 : vector<8x128xf32>
    %51 = vector.extract_strided_slice %24 {offsets = [0, 16], sizes = [8, 128], strides = [1, 1]} : vector<8x160xf32> to vector<8x128xf32>
    %c5 = arith.constant 5 : index
    %c0_44 = arith.constant 0 : index
    %c0_45 = arith.constant 0 : index
    %52 = vector.load %arg5[%c5, %c0_44, %c0_45] : memref<9x8x8xf32, #tpu.memory_space<vmem>>, vector<1x8x8xf32>
    %53 = vector.shape_cast %52 : vector<1x8x8xf32> to vector<8x8xf32>
    %cst_46 = arith.constant dense<0.000000e+00> : vector<8x128xf32>
    %54 = tpu.matmul %53, %51, %cst_46 {dimension_numbers = #tpu.dot_dimension_numbers<[1], [0], [0], [1], [0, 0, 1, 1], [], []>} : vector<8x8xf32>, vector<8x128xf32>, vector<8x128xf32> -> vector<8x128xf32>
    %55 = arith.addf %50, %54 : vector<8x128xf32>
    %56 = vector.extract_strided_slice %18 {offsets = [0, 32], sizes = [8, 128], strides = [1, 1]} : vector<8x160xf32> to vector<8x128xf32>
    %c6 = arith.constant 6 : index
    %c0_47 = arith.constant 0 : index
    %c0_48 = arith.constant 0 : index
    %57 = vector.load %arg5[%c6, %c0_47, %c0_48] : memref<9x8x8xf32, #tpu.memory_space<vmem>>, vector<1x8x8xf32>
    %58 = vector.shape_cast %57 : vector<1x8x8xf32> to vector<8x8xf32>
    %cst_49 = arith.constant dense<0.000000e+00> : vector<8x128xf32>
    %59 = tpu.matmul %58, %56, %cst_49 {dimension_numbers = #tpu.dot_dimension_numbers<[1], [0], [0], [1], [0, 0, 1, 1], [], []>} : vector<8x8xf32>, vector<8x128xf32>, vector<8x128xf32> -> vector<8x128xf32>
    %60 = arith.addf %55, %59 : vector<8x128xf32>
    %61 = vector.extract_strided_slice %19 {offsets = [0, 32], sizes = [8, 128], strides = [1, 1]} : vector<8x160xf32> to vector<8x128xf32>
    %c7 = arith.constant 7 : index
    %c0_50 = arith.constant 0 : index
    %c0_51 = arith.constant 0 : index
    %62 = vector.load %arg5[%c7, %c0_50, %c0_51] : memref<9x8x8xf32, #tpu.memory_space<vmem>>, vector<1x8x8xf32>
    %63 = vector.shape_cast %62 : vector<1x8x8xf32> to vector<8x8xf32>
    %cst_52 = arith.constant dense<0.000000e+00> : vector<8x128xf32>
    %64 = tpu.matmul %63, %61, %cst_52 {dimension_numbers = #tpu.dot_dimension_numbers<[1], [0], [0], [1], [0, 0, 1, 1], [], []>} : vector<8x8xf32>, vector<8x128xf32>, vector<8x128xf32> -> vector<8x128xf32>
    %65 = arith.addf %60, %64 : vector<8x128xf32>
    %66 = vector.extract_strided_slice %24 {offsets = [0, 32], sizes = [8, 128], strides = [1, 1]} : vector<8x160xf32> to vector<8x128xf32>
    %c8 = arith.constant 8 : index
    %c0_53 = arith.constant 0 : index
    %c0_54 = arith.constant 0 : index
    %67 = vector.load %arg5[%c8, %c0_53, %c0_54] : memref<9x8x8xf32, #tpu.memory_space<vmem>>, vector<1x8x8xf32>
    %68 = vector.shape_cast %67 : vector<1x8x8xf32> to vector<8x8xf32>
    %cst_55 = arith.constant dense<0.000000e+00> : vector<8x128xf32>
    %69 = tpu.matmul %68, %66, %cst_55 {dimension_numbers = #tpu.dot_dimension_numbers<[1], [0], [0], [1], [0, 0, 1, 1], [], []>} : vector<8x8xf32>, vector<8x128xf32>, vector<8x128xf32> -> vector<8x128xf32>
    %70 = arith.addf %65, %69 : vector<8x128xf32>
    %c0_56 = arith.constant 0 : index
    %c0_57 = arith.constant 0 : index
    %71 = vector.load %arg6[%c0_56, %c0_57] : memref<8x1xf32, #tpu.memory_space<vmem>>, vector<8x1xf32>
    %72 = vector.broadcast %71 : vector<8x1xf32> to vector<8x128xf32>
    %73 = arith.addf %70, %72 : vector<8x128xf32>
    %cst_58 = arith.constant 0.000000e+00 : f32
    %74 = vector.broadcast %cst_58 : f32 to vector<8x128xf32>
    %75 = arith.maximumf %73, %74 : vector<8x128xf32>
    %c0_59 = arith.constant 0 : index
    %c0_60 = arith.constant 0 : index
    %76 = vector.load %arg7[%c0_59, %c0_60] : memref<20x8xf32, #tpu.memory_space<vmem>>, vector<20x8xf32>
    %cst_61 = arith.constant dense<0.000000e+00> : vector<20x128xf32>
    %77 = tpu.matmul %76, %75, %cst_61 {dimension_numbers = #tpu.dot_dimension_numbers<[1], [0], [0], [1], [0, 0, 1, 1], [], []>} : vector<20x8xf32>, vector<8x128xf32>, vector<20x128xf32> -> vector<20x128xf32>
    %c0_62 = arith.constant 0 : index
    %c0_63 = arith.constant 0 : index
    %78 = vector.load %arg8[%c0_62, %c0_63] : memref<20x1xf32, #tpu.memory_space<vmem>>, vector<20x1xf32>
    %79 = vector.broadcast %78 : vector<20x1xf32> to vector<20x128xf32>
    %80 = arith.addf %77, %79 : vector<20x128xf32>
    %81 = vector.extract_strided_slice %80 {offsets = [0, 0], sizes = [16, 128], strides = [1, 1]} : vector<20x128xf32> to vector<16x128xf32>
    %c0_64 = arith.constant 0 : index
    %c0_65 = arith.constant 0 : index
    %c0_66 = arith.constant 0 : index
    %82 = vector.load %arg9[%c0_64, %c0_65, %c0_66] : memref<1x16x128xf32, #tpu.memory_space<vmem>>, vector<1x16x128xf32>
    %83 = vector.shape_cast %82 : vector<1x16x128xf32> to vector<16x128xf32>
    %84 = vector.shape_cast %81 : vector<16x128xf32> to vector<1x16x128xf32>
    tpu.vector_store %arg9[%c0_64, %c0_65, %c0_66], %84 {strides = array<i32>} : memref<1x16x128xf32, #tpu.memory_space<vmem>>, vector<1x16x128xf32>,
    %85 = vector.extract_strided_slice %80 {offsets = [16, 0], sizes = [4, 128], strides = [1, 1]} : vector<20x128xf32> to vector<4x128xf32>
    %c0_67 = arith.constant 0 : index
    %c0_68 = arith.constant 0 : index
    %c0_69 = arith.constant 0 : index
    %86 = vector.load %arg10[%c0_67, %c0_68, %c0_69] : memref<1x4x128xf32, #tpu.memory_space<vmem>>, vector<1x4x128xf32>
    %87 = vector.shape_cast %86 : vector<1x4x128xf32> to vector<4x128xf32>
    %88 = vector.shape_cast %85 : vector<4x128xf32> to vector<1x4x128xf32>
    tpu.vector_store %arg10[%c0_67, %c0_68, %c0_69], %88 {strides = array<i32>} : memref<1x4x128xf32, #tpu.memory_space<vmem>>, vector<1x4x128xf32>,
    return
  }
  func.func @transform_0(%arg0: i32, %arg1: i32) -> (i32, i32, i32) {
    %c0_i32 = arith.constant 0 : i32
    %c0_i32_0 = arith.constant 0 : i32
    return %arg0, %c0_i32, %arg1 : i32, i32, i32
  }
  func.func @transform_1(%arg0: i32, %arg1: i32) -> (i32, i32, i32, i32, i32) {
    %c0_i32 = arith.constant 0 : i32
    %c0_i32_0 = arith.constant 0 : i32
    %c0_i32_1 = arith.constant 0 : i32
    %c0_i32_2 = arith.constant 0 : i32
    return %arg0, %arg1, %c0_i32, %c0_i32_0, %c0_i32_1 : i32, i32, i32, i32, i32
  }
  func.func @transform_2(%arg0: i32, %arg1: i32) -> (i32, i32, i32) {
    %c0_i32 = arith.constant 0 : i32
    %c0_i32_0 = arith.constant 0 : i32
    %c0_i32_1 = arith.constant 0 : i32
    %c0_i32_2 = arith.constant 0 : i32
    return %c0_i32, %c0_i32_0, %c0_i32_1 : i32, i32, i32
  }
  func.func @transform_3(%arg0: i32, %arg1: i32) -> (i32, i32, i32) {
    %c0_i32 = arith.constant 0 : i32
    %c0_i32_0 = arith.constant 0 : i32
    %c0_i32_1 = arith.constant 0 : i32
    %c0_i32_2 = arith.constant 0 : i32
    return %c0_i32, %c0_i32_0, %c0_i32_1 : i32, i32, i32
  }
  func.func @transform_4(%arg0: i32, %arg1: i32) -> (i32, i32) {
    %c0_i32 = arith.constant 0 : i32
    %c0_i32_0 = arith.constant 0 : i32
    %c0_i32_1 = arith.constant 0 : i32
    return %c0_i32, %c0_i32_0 : i32, i32
  }
  func.func @transform_5(%arg0: i32, %arg1: i32) -> (i32, i32) {
    %c0_i32 = arith.constant 0 : i32
    %c0_i32_0 = arith.constant 0 : i32
    %c0_i32_1 = arith.constant 0 : i32
    return %c0_i32, %c0_i32_0 : i32, i32
  }
  func.func @transform_6(%arg0: i32, %arg1: i32) -> (i32, i32) {
    %c0_i32 = arith.constant 0 : i32
    %c0_i32_0 = arith.constant 0 : i32
    %c0_i32_1 = arith.constant 0 : i32
    return %c0_i32, %c0_i32_0 : i32, i32
  }
  func.func @transform_7(%arg0: i32, %arg1: i32) -> (i32, i32, i32) {
    %c0_i32 = arith.constant 0 : i32
    %c0_i32_0 = arith.constant 0 : i32
    return %arg0, %c0_i32, %arg1 : i32, i32, i32
  }
  func.func @transform_8(%arg0: i32, %arg1: i32) -> (i32, i32, i32) {
    %c0_i32 = arith.constant 0 : i32
    %c0_i32_0 = arith.constant 0 : i32
    return %arg0, %c0_i32, %arg1 : i32, i32, i32
  }
}

</mosaic_0001>

<bundles_post_ra>
// kernel: tpu_custom_call.1
= control target key start
LH: loop header
LB: loop body
LE: loop exit
PB: predicated region body
PF: predicated region fallthrough
CT: control target
= control target key end

     0   :  { %14 = vsyncpa [#allocation4], 0  ;;  %s1544_s0 = inlined_call_operand.vmem [shape: f32[2,8,256], index: 0, kind: input, shape index: {}]   ;;  %s1545_s1 = inlined_call_operand.vmem [shape: f32[2,2,2,8,16], index: 1, kind: input, shape index: {}]   ;;  %s1546_s2 = inlined_call_operand.vmem [shape: f32[2,1,160], index: 2, kind: input, shape index: {}]   ;;  %s1547_s3 = inlined_call_operand.vmem [shape: f32[9,8,8], index: 3, kind: input, shape index: {}]   ;;  %s1548_s4 = inlined_call_operand.vmem [shape: f32[8,1], index: 4, kind: input, shape index: {}]   ;;  %s1549_s5 = inlined_call_operand.vmem [shape: f32[20,8], index: 5, kind: input, shape index: {}]   ;;  %s1550_s6 = inlined_call_operand.vmem [shape: f32[20,1], index: 6, kind: input, shape index: {}]   ;;  %s1551_s7 = inlined_call_operand.hbm [shape: f32[2,16,256], index: 7, kind: output, shape index: {0}]   ;;  %s1552_s8 = inlined_call_operand.hbm [shape: f32[2,4,256], index: 8, kind: output, shape index: {1}]  }
   0x1   :  { %16 = vsyncpa [#allocation4 + $0x1], 0 }
   0x2   :  { %17 = vsyncpa [#allocation6], 0 }
   0x3   :  { %19 = vsyncpa [#allocation6 + $0x1], 0  ;;  %s1329_s27 = smov 0   ;;  %s1331_s28 = smov 0  }
   0x4   :  { %s1333_s29 = smov 0   ;;  %s1335_s30 = smov 0  }
   0x5   :  { %s1337_s9 = smov 0   ;;  %s1339_s10 = smov 0  }
   0x6   :  { %s1341_s11 = smov 0   ;;  %s1343_s12 = smov 0  }
   0x7 LB: > { %1560 = sst [smem:[#allocation9_spill]] %s1238_s27  ;;  %s964_s13 = sadd.s32 4294967295, %s1266_s12   ;;  %s1266_s12 = sphi %s1343_s12, %s25_s12   ;;  %s1262_s11 = sphi %s1341_s11, %s1577_s11   ;;  %s1258_s10 = sphi %s1339_s10, %s1576_s10   ;;  %s1254_s9 = sphi %s1337_s9, %s1575_s9   ;;  %s1250_s30 = sphi %s1335_s30, %s1574_s30   ;;  %s1246_s29 = sphi %s1333_s29, %s1573_s29   ;;  %s1242_s28 = sphi %s1331_s28, %s1579_s28   ;;  %s1238_s27 = sphi %s1329_s27, %s1578_s27  }
   0x8   : > { %1561 = sst [smem:[#allocation10_spill]] %s1246_s29  ;;  %s965_s14 = sadd.s32 4294967294, %s1266_s12  }
   0x9   : > { %1562 = sst [smem:[#allocation11_spill]] %s1258_s10  ;;  %s34_s15 = sadd.s32 1, %s1258_s10 }
   0xa   : > { %1563 = sst [smem:[#allocation12_spill]] %s1262_s11  ;;  %p35_p0 = scmp.ge.s32.totalorder %s34_s15, 2 }
   0xb   : > { %s37_s16 = sadd.s32 1, %s1262_s11  ;;  %p217_p1 = scmp.ne.s32.totalorder %s1246_s29, %s1242_s28 }
   0xc   : > { %p218_p2 = scmp.eq.s32.totalorder %s964_s13, 3  ;;  %s1581_s15 = smov (%p35_p0, %s34_s15), 0 }
   0xd   : > { %1564 = sst [smem:[#allocation13_spill]] %s1581_s15  ;;  %s1583_s16 = smov (!%p35_p0, %s37_s16), %s1262_s11 }
   0xe   : > { %s203_s17 = ssub.s32 %s1258_s10, %s1581_s15  ;;  %p1380_p3 = por %p218_p2, %p217_p1 }
   0xf   : > { %p39_p4 = scmp.ge.s32.totalorder %s1583_s16, 2  ;;  %p223_p5 = scmp.ne.s32.totalorder %s1242_s28, %s1238_s27 }
  0x10   : > { %p224_p6 = scmp.eq.s32.totalorder %s965_s14, 3  ;;  %p968_p7 = scmp.ge.s32.totalorder %s1266_s12, 1 }
  0x11   : > { %s1585_s16 = smov (%p39_p4, %s1583_s16), 0  ;;  %p308_p9 = scmp.lt.s32.totalorder %s1266_s12, 5 }
  0x12   : > { %1566 = sst [smem:[#allocation14_spill]] %s1585_s16  ;;  %p1389_p8 = por %p224_p6, %p223_p5 }
  0x13   : > { %s202_s20 = ssub.s32 %s1262_s11, %s1585_s16  ;;  %s207_s21 = sadd.s32 1, %s1246_s29 }
  0x14   : > { %s1567_s19 = scalar_select %p1389_p8, 1, 0 }
  0x15   : > { %s204_s22 = sor.u32 %s203_s17, %s202_s20  ;;  %p309_p10 = pnand %p968_p7, %p308_p9 }
  0x16   : > { %1568 = sst [smem:[#allocation15_spill]] %s1567_s19  ;;  %p205_p11 = scmp.eq.s32.totalorder %s204_s22, 0 }
  0x17   : > { %312 = sbr.rel (%p309_p10) target bundleno = 595 (0x253), region = 48  ;;  %p359_p12 = scmp.lt.s32.totalorder (!%p309_p10), %s1254_s9, 1 }
  0x18   : > { %s1398_s23 = scalar_select %p205_p11, %s1246_s29, %s207_s21  }
  0x19   : > { %p361_p13 = scmp.lt.s32.totalorder (!%p309_p10), %s1250_s30, 1  ;;  %s1269_s15 = smov (!%p309_p10), 2  }
  0x1a   : > { %1569 = sst [smem:[#allocation16_spill]] %s1398_s23  ;;  %s1273_s11 = smov (!%p309_p10), 126  }
  0x1b   : > { %s1274_s16 = smov (!%p309_p10), 112   ;;  %s1275_s19 = smov (!%p309_p10), 111  }
  0x1c   : > { %s360_s24 = scalar_select %p359_p12, %s1254_s9, 1  ;;  %v976_v0 = vld [vmem:[%s1546_s2 + $0x2] sm:$0x3]  ;;  %vm378_vm0 = vcmask 7168   ;;  %v1271_v6 = vmov 0.0   ;;  %vm393_vm1 = vcmask 138240  }
  0x1d   : > { %s362_s25 = scalar_select %p361_p13, %s1250_s30, 1  ;;  %v417_v1 = vperm.slane %v976_v0, 1  ;;  %v416_v5 = vperm.slane %v976_v0, 0  ;;  %379 = vst.msk [vmem:[#allocation2] sm:$0xff] %vm378_vm0, %v1271_v6  ;;  %vm399_vm2 = vcmask 269448   ;;  %vm401_vm3 = vcmask 277768  }
  0x1e   : > { %s971_s26 = sshll.u32 %s360_s24, 1  ;;  %s974_s13 = sshll.u32 %s360_s24, 2  ;;  %vm384_vm4 = vcmask 138248   ;;  %vm391_vm5 = vcmask 1047688   ;;  %v405_v10 = vld [vmem:[%s1546_s2] sm:$0x3] }
  0x1f   : > { %s364_s17 = sadd.s32 %s971_s26, %s362_s25  ;;  %s973_s20 = sshll.u32 %s362_s25, 1  ;;  %420 = vrot.lane.b32.xlu2 %v417_v1, %s1269_s15  ;;  %vm422_vm6 = vcmask 15360   ;;  %v408_v13 = vperm.slane %v405_v10, 1  ;;  %v407_v16 = vperm.slane %v405_v10, 0  ;;  %vm440_vm7 = vcmask 64512   ;;  %v428_v25 = vld [vmem:[%s1547_s3] sm:$0xff] }
  0x20   : > { %s972_s21 = sshll.u32 %s364_s17, 3  ;;  %s373_s22 = sadd.s32 %s974_s13, %s973_s20  ;;  %vm530_vm8 = vcmask 916480   ;;  %v982_v29 = vld [vmem:[%s1547_s3 + $0x18] sm:$0xff]  ;;  %vm596_vm9 = vcmask 900096   ;;  %v986_v34 = vld [vmem:[%s1547_s3 + $0x28] sm:$0xff]  ;;  %v722_v36 = vld [vmem:[%s1548_s4] sm:$0xff] }
  0x21   : > { %s366_s10 = scalar_lea.vmem %s1544_s0, %s972_s21  ;;  %s975_s23 = sshll.u32 %s373_s22, 3  ;;  %v1280_v37 = vmov 0   ;;  %vm662_vm10 = vcmask 777216   ;;  %v990_v41 = vld [vmem:[%s1547_s3 + $0x38] sm:$0xff]  ;;  %v735_v43 = vld [vmem:[%s1550_s6 + $0x10] sm:$0xf] }
  0x22   : > { %v386_v2 = vld [vmem:[%s366_s10] sm:$0xff]  ;;  %s375_s27 = scalar_lea.vmem %s1545_s1, %s975_s23  ;;  %s1268_s24 = smov 17   ;;  %1137 = vset.pattern.permute.xlu1 %v1280_v37  ;;  %1139 = vset.pattern.permute.xlu0 %v1280_v37  ;;  %vm437_vm11 = vcmask 1039360   ;;  %vm495_vm12 = vcmask 1031168   ;;  %v977_v48 = vld [vmem:[%s1547_s3 + $0x8] sm:$0xff]  ;;  %v980_v52 = vld [vmem:[%s1547_s3 + $0x10] sm:$0xff] }
  0x23   : > { %388 = vrot.lane.b32.xlu0 %v386_v2, %s1268_s24  ;;  %v377_v3 = vld [vmem:[%s375_s27 + $0x8] sm:$0xff]  ;;  %v376_v4 = vld [vmem:[%s375_s27] sm:$0xff]  ;;  %s1270_s25 = smov 1   ;;  %s1272_s10 = smov 127   ;;  %1138 = vset.pattern.permute.xlu2 %v1280_v37  ;;  %vm563_vm13 = vcmask 908288   ;;  %vm629_vm14 = vcmask 785408  }
  0x24   : > { %396 = vrot.lane.b32.xlu1 %v377_v3, %s1268_s24  ;;  %s1276_s23 = smov 96   ;;  %s1277_s26 = smov 110   ;;  %v984_v58 = vld [vmem:[%s1547_s3 + $0x20] sm:$0xff]  ;;  %v988_v62 = vld [vmem:[%s1547_s3 + $0x30] sm:$0xff]  ;;  %vm695_vm15 = vcmask 769024  }
  0x25   : > { %s1278_s13 = smov 94   ;;  %s1279_s14 = smov 95   ;;  %v992_v3 = vld [vmem:[%s1547_s3 + $0x40] sm:$0xff] }
  0x26   : > { %s1001_s22 = sshll.u32 %s1254_s9, 1 }
  0x2b   : > { %381 = vrot.lane.b32.xlu0 %v376_v4, %s1270_s25 }
  0x2c   : > { %418 = vrot.lane.b32.xlu1 %v416_v5, %s1269_s15 }
  0x79   : > { %v421_v11 = vpop.permute.xlu2 %420 }
  0x95   : > { %v389_v7 = vpop.permute.xlu0 %388 }
  0x96   : > { %394 = vst.msk [vmem:[#allocation2 + $0x8] sm:$0xff] %vm393_vm1, %v389_v7  ;;  %v397_v8 = vpop.permute.xlu1 %396 }
  0x97   : > { %400 = vst.msk [vmem:[#allocation2 + $0x8] sm:$0xff] %vm399_vm2, %v397_v8 }
  0x98   : > { %402 = vst.msk [vmem:[#allocation2 + $0x8] sm:$0xff] %vm401_vm3, %v1271_v6 }
  0x9d   : > { %v382_v9 = vpop.permute.xlu0 %381 }
  0x9e   : > { %385 = vst.msk [vmem:[#allocation2] sm:$0xff] %vm384_vm4, %v382_v9  ;;  %v419_v12 = vpop.permute.xlu1 %418 }
  0x9f   : > { %392 = vst.msk [vmem:[#allocation2] sm:$0xff] %vm391_vm5, %v389_v7  ;;  %v404_v14 = vld [vmem:[#allocation2 + $0x8] sm:$0xff]  ;;  %v423_v15 = vsel %vm422_vm6, %v419_v12, %v421_v11 }
  0xa0   : > { %v427_v17 = vmul.f32 %v423_v15, %v404_v14  ;;  %v412_v18 = vmul.f32 %v408_v13, %v404_v14  ;;  %v733_v15 = vld [vmem:[%s1550_s6] sm:$0xff] }
  0xa6   : > { %v403_v19 = vld [vmem:[#allocation2] sm:$0xff] }
  0xa7   : > { %v426_v20 = vmul.f32 %v419_v12, %v403_v19  ;;  %v1097_v21 = vpack.i.bf16 %v404_v14, %v403_v19  ;;  %v411_v22 = vmul.f32 %v407_v16, %v403_v19  ;;  %v734_v14 = vld [vmem:[%s1550_s6 + $0x8] sm:$0xff] }
  0xa9   : > { %1098 = vrot.lane.b32.xlu1 %v1097_v21, %s1272_s10  ;;  %482 = vmatpush.msra.mxu2 %v411_v22  ;;  %v1107_v23 = vpack.i.bf16 %v427_v17, %v426_v20  ;;  %v1102_v24 = vpack.i.bf16 %v412_v18, %v411_v22  ;;  %s823_s10 = sadd.s32 %s1250_s30, %s1001_s22  ;;  %s1160_s22 = scalar_lea.hbm %s1551_s7, 64 }
  0xaa   : > { %979 = vmatmul.msk.f32.vlgmr.msra.gmra.mxu2 %vm440_vm7, %v428_v25 }
  0xab   : > { %1108 = vrot.lane.b32.xlu0 %v1107_v23, %s1273_s11  ;;  %1103 = vrot.lane.b32.xlu2 %v1102_v24, %s1274_s16 }
  0xb1   : > { %1123 = vrot.lane.b32.xlu1 %v1097_v21, %s1275_s19  ;;  %s1002_s19 = sshll.u32 %s823_s10, 2 }
  0xb3   : > { %1118 = vrot.lane.b32.xlu0 %v1102_v24, %s1276_s23  ;;  %1113 = vrot.lane.b32.xlu2 %v1107_v23, %s1277_s26  ;;  %s825_s26 = scalar_lea.hbm %s1552_s8, %s1002_s19 }
  0xb9   : > { %725 = vperm.xlu1 %1137, %v722_v36  }
  0xbb   : > { %1133 = vrot.lane.b32.xlu0 %v1107_v23, %s1278_s13  ;;  %1128 = vrot.lane.b32.xlu2 %v1097_v21, %s1279_s14  ;;  %s999_s13 = sshll.u32 %s1254_s9, 2  ;;  %s1478_s14 = sand.u32 1, %s1242_s28  }
  0xbc   : > { %s805_s17 = sadd.s32 %s1250_s30, %s999_s13  ;;  %s969_s20 = sshll.u32 %s1478_s14, 4 }
  0xbd   : > { %s1000_s21 = sshll.u32 %s805_s17, 3  ;;  %s351_s27 = scalar_lea.vmem [#allocation3], %s969_s20 }
  0xbe   : > { %s807_s25 = scalar_lea.hbm %s1551_s7, %s1000_s21  ;;  %s808_s29 = sshll.u32 %s351_s27, 4  ;;  %s1487_s29 = int_to_ptr.vmem [resolvable:$true] %s808_s29 }
  0xbf   : > { %s810_s11 = sshll.u32 %s807_s25, 4  ;;  %s970_s16 = sshll.u32 %s1478_s14, 2  ;;  %s811_s11 = int_to_ptr.hbm [resolvable:$true] %s810_s11 }
  0xc0   : > { %s790_s13 = scalar_lea.sflag [#allocation4], %s1478_s14  ;;  %s1154_s17 = sshra.s32 %s811_s11, 4  ;;  %s1155_s17 = int_to_ptr.hbm [resolvable:$true] %s1154_s17 }
  0xc1   : > { %748 = vperm.xlu1 %1137, %v735_v43   ;;  %s1156_s20 = scalar_lea.hbm %s1155_s17, 16  ;;  %p1161_p4 = scmp.lt.s32.totalorder %s1155_s17, %s1551_s7 }
  0xc2   : > { %p1157_p0 = scmp.ne.s32.totalorder %s1155_s17, %s1156_s20  ;;  %p1162_p5 = scmp.lt.s32.totalorder %s1160_s22, %s1156_s20 }
  0xc3   : > { %743 = vperm.xlu0 %1139, %v734_v14   ;;  %738 = vperm.xlu2 %1138, %v733_v15  }
  0xc4   : > { %p1158_p1 = pnand %p1157_p0, %p1380_p3  ;;  %p1163_p6 = por %p1162_p5, %p1161_p4 }
  0xc6   : > { %p1159_p2 = pneg %p1158_p1 }
  0xc8   : > { %p1164_p7 = pnand %p1163_p6, %p1159_p2 }
 0x105   : > { %v1104_v26 = vpop.permute.xlu2 %1103 }
 0x106   : > { %v1106_v27 = vunpack.i.h.bf16 %v1104_v26  ;;  %v1105_v28 = vunpack.i.l.bf16 %v1104_v26 }
 0x108   : > { %v531_v30 = vsel %vm530_vm8, %v1105_v28, %v1106_v27  ;;  %v730_v27 = vld [vmem:[%s1549_s5] sm:$0xff]  ;;  %v731_v28 = vld [vmem:[%s1549_s5 + $0x8] sm:$0xff] }
 0x109   : > { %551 = vmatpush.msra.mxu3 %v531_v30 }
 0x10a   : > { %983 = vmatmul.msk.f32.vlgmr.msra.gmra.mxu3 %vm440_vm7, %v982_v29  ;;  %v732_v29 = vld [vmem:[%s1549_s5 + $0x10] sm:$0xf] }
 0x10d   : > { %v1114_v31 = vpop.permute.xlu2 %1113 }
 0x10e   : > { %v1116_v32 = vunpack.i.h.bf16 %v1114_v31  ;;  %v1115_v33 = vunpack.i.l.bf16 %v1114_v31 }
 0x110   : > { %v597_v35 = vsel %vm596_vm9, %v1115_v33, %v1116_v32 }
 0x111   : > { %617 = vmatpush.msrb.mxu3 %v597_v35 }
 0x112   : > { %987 = vmatmul.msk.f32.vlgmr.msrb.gmra.mxu3 %vm440_vm7, %v986_v34 }
 0x115   : > { %v1129_v38 = vpop.permute.xlu2 %1128 }
 0x116   : > { %v1131_v39 = vunpack.i.h.bf16 %v1129_v38  ;;  %v1130_v40 = vunpack.i.l.bf16 %v1129_v38 }
 0x118   : > { %v663_v42 = vsel %vm662_vm10, %v1130_v40, %v1131_v39 }
 0x119   : > { %683 = vmatpush.msra.mxu3 %v663_v42 }
 0x11a   : > { %991 = vmatmul.msk.f32.vlgmr.msra.gmra.mxu3 %vm440_vm7, %v990_v41 }
 0x11b   : > { %v1099_v44 = vpop.permute.xlu1 %1098 }
 0x11c   : > { %v1101_v45 = vunpack.i.h.bf16 %v1099_v44  ;;  %v1100_v46 = vunpack.i.l.bf16 %v1099_v44 }
 0x11d   : > { %v1109_v47 = vpop.permute.xlu0 %1108  ;;  %v739_v30 = vpop.permute.xlu2 %738 }
 0x11e   : > { %v1111_v49 = vunpack.i.h.bf16 %v1109_v47  ;;  %v1110_v50 = vunpack.i.l.bf16 %v1109_v47  ;;  %v438_v51 = vsel %vm437_vm11, %v1100_v46, %v1101_v45 }
 0x11f   : > { %459 = vmatpush.msra.mxu0 %v438_v51 }
 0x120   : > { %v496_v53 = vsel %vm495_vm12, %v1110_v50, %v1111_v49  ;;  %978 = vmatmul.msk.f32.vlgmr.msra.gmra.mxu0 %vm440_vm7, %v977_v48 }
 0x121   : > { %516 = vmatpush.msrb.mxu2 %v496_v53 }
 0x122   : > { %981 = vmatmul.msk.f32.vlgmr.msrb.gmra.mxu2 %vm440_vm7, %v980_v52 }
 0x123   : > { %v1124_v54 = vpop.permute.xlu1 %1123 }
 0x124   : > { %v1126_v55 = vunpack.i.h.bf16 %v1124_v54  ;;  %v1125_v56 = vunpack.i.l.bf16 %v1124_v54 }
 0x125   : > { %v1119_v57 = vpop.permute.xlu0 %1118 }
 0x126   : > { %v1121_v59 = vunpack.i.h.bf16 %v1119_v57  ;;  %v1120_v60 = vunpack.i.l.bf16 %v1119_v57  ;;  %v564_v61 = vsel %vm563_vm13, %v1125_v56, %v1126_v55 }
 0x127   : > { %584 = vmatpush.msrb.mxu0 %v564_v61 }
 0x128   : > { %v630_v63 = vsel %vm629_vm14, %v1120_v60, %v1121_v59  ;;  %985 = vmatmul.msk.f32.vlgmr.msrb.gmra.mxu0 %vm440_vm7, %v984_v58 }
 0x129   : > { %650 = vmatpush.msra.mxu2 %v630_v63 }
 0x12a   : > { %989 = vmatmul.msk.f32.vlgmr.msra.gmra.mxu2 %vm440_vm7, %v988_v62 }
 0x12b   : > { %v726_v24 = vpop.permute.xlu1 %725 }
 0x12d   : > { %v1134_v0 = vpop.permute.xlu0 %1133  ;;  %v484_v6 = vpop.f32.mrf.mxu2 }
 0x12e   : > { %v1136_v1 = vunpack.i.h.bf16 %v1134_v0  ;;  %v1135_v2 = vunpack.i.l.bf16 %v1134_v0 }
 0x130   : > { %v696_v4 = vsel %vm695_vm15, %v1135_v2, %v1136_v1 }
 0x131   : > { %716 = vmatpush.msra.mxu0 %v696_v4 }
 0x132   : > { %993 = vmatmul.msk.f32.vlgmr.msra.gmra.mxu0 %vm440_vm7, %v992_v3 }
 0x135   : > { %v744_v33 = vpop.permute.xlu0 %743 }
 0x18d   : > { %v553_v5 = vpop.f32.mrf.mxu3 }
 0x195   : > { %v619_v8 = vpop.f32.mrf.mxu3 }
 0x19d   : > { %v461_v7 = vpop.f32.mrf.mxu0  ;;  %v685_v19 = vpop.f32.mrf.mxu3 }
 0x19e   : > { %v485_v9 = vadd.f32 %v484_v6, %v461_v7 }
 0x1a5   : > { %v518_v10 = vpop.f32.mrf.mxu2  ;;  %v586_v11 = vpop.f32.mrf.mxu0 }
 0x1a6   : > { %v521_v12 = vadd.f32 %v518_v10, %v485_v9 }
 0x1a8   : > { %v556_v13 = vadd.f32 %v553_v5, %v521_v12 }
 0x1aa   : > { %v589_v16 = vadd.f32 %v586_v11, %v556_v13 }
 0x1ac   : > { %v622_v17 = vadd.f32 %v619_v8, %v589_v16 }
 0x1ad   : > { %v652_v18 = vpop.f32.mrf.mxu2 }
 0x1ae   : > { %v655_v20 = vadd.f32 %v652_v18, %v622_v17 }
 0x1af   : > { %v718_v21 = vpop.f32.mrf.mxu0 }
 0x1b0   : > { %v688_v22 = vadd.f32 %v685_v19, %v655_v20 }
 0x1b2   : > { %v721_v23 = vadd.f32 %v718_v21, %v688_v22 }
 0x1b4   : > { %v728_v25 = vadd.f32 %v726_v24, %v721_v23 }
 0x1b6   : > { %v729_v26 = vmax.f32 %v728_v25, 0.0 }
 0x1b8   : > { %775 = vmatpush.msra.mxu1 %v729_v26 }
 0x1b9   : > { %994 = vmatmul.msk.f32.vlgmr.msra.gmra.mxu1 %vm440_vm7, %v730_v27 }
 0x1c1   : > { %995 = vmatmul.msk.f32.gmra.mxu1 %vm440_vm7, %v731_v28 }
 0x1c9   : > { %996 = vmatmul.msk.f32.gmra.mxu1 %vm440_vm7, %v732_v29 }
 0x236   : > { %v777_v31 = vpop.f32.mrf.mxu1 }
 0x237   : > { %v778_v32 = vadd.f32 %v777_v31, %v739_v30 }
 0x239   : > { %786 = vst [vmem:[%s351_s27] sm:$0xff] %v778_v32 }
 0x23e   : > { %v780_v34 = vpop.f32.mrf.mxu1 }
 0x23f   : > { %v781_v35 = vadd.f32 %v780_v34, %v744_v33 }
 0x241   : > { %787 = vst [vmem:[%s351_s27 + $0x8] sm:$0xff] %v781_v35 }
 0x242   : > { %1167 = shalt.err (!%p1164_p7)
}
 0x243   : > { %s1281_s25 = smov 128   ;;  %s1282_s27 = smov 256   ;;  %v749_v36 = vpop.permute.xlu1 %748 }
 0x244   : > { %s1283_s10 = smov 8   ;;  %s358_s19 = scalar_lea.vmem [#allocation5], %s970_s16 }
 0x245   : > { %1005 = dma.vmem_to_hbm [thread:$0]  (%p1380_p3), %s1487_s29, 256, %s811_s11, %s790_s13, %s1281_s25, %s1282_s27, %s1283_s10  }
 0x246   : > { %s827_s9 = sshll.u32 %s358_s19, 4  ;;  %s829_s23 = sshll.u32 %s825_s26, 4  ;;  %v783_v37 = vpop.f32.mrf.mxu1  ;;  %s828_s9 = int_to_ptr.vmem [resolvable:$true] %s827_s9  ;;  %s830_s23 = int_to_ptr.hbm [resolvable:$true] %s829_s23 }
 0x247   : > { %v784_v38 = vadd.f32 %v783_v37, %v749_v36  ;;  %s795_s17 = scalar_lea.sflag [#allocation6], %s1478_s14  ;;  %s1182_s20 = sshra.s32 %s830_s23, 4  ;;  %s1183_s20 = int_to_ptr.hbm [resolvable:$true] %s1182_s20 }
 0x248   : > { %s1184_s30 = scalar_lea.hbm %s1183_s20, 4  ;;  %s1188_s29 = scalar_lea.hbm %s1552_s8, 16 }
 0x249   : > { %788 = vst [vmem:[%s358_s19] sm:$0xf] %v784_v38  ;;  %p1185_p9 = scmp.ne.s32.totalorder %s1183_s20, %s1184_s30  ;;  %p1189_p12 = scmp.lt.s32.totalorder %s1183_s20, %s1552_s8 }
 0x24a   : > { %p1190_p13 = scmp.lt.s32.totalorder %s1188_s29, %s1184_s30 }
 0x24b   : > { %p1186_p10 = pnand %p1185_p9, %p1380_p3 }
 0x24c   : > { %p1191_p0 = por %p1190_p13, %p1189_p12 }
 0x24d   : > { %p1187_p11 = pneg %p1186_p10 }
 0x24f   : > { %p1192_p1 = pnand %p1191_p0, %p1187_p11 }
 0x251   : > { %1195 = shalt.err (!%p1192_p1)
}
 0x252   : > { %1006 = dma.vmem_to_hbm [thread:$0]  (%p1380_p3), %s828_s9, 64, %s830_s23, %s795_s17  }
 0x253 PF: > { %s1570_s14 = sld [smem:[#allocation9_spill]]  ;;  %p1016_p2 = scmp.ge.s32.totalorder %s1266_s12, 2 }
 0x255   : > { %p1010_p4 = pnand %p1016_p2, %p1389_p8 }
 0x257   : > { %p1011_p5 = pneg %p1010_p4 }
 0x259   : > { %s841_s13 = sand.u32 1, %s1570_s14  }
 0x25a   : > { %s842_s24 = scalar_lea.sflag [#allocation4], %s841_s13 }
 0x25b   : > { %1229 = dma.done.wait (%p1011_p5), %s842_s24, 256  }
 0x25c   : > { %1231 = vsyncadd (%p1011_p5), %s842_s24, 4294967040  ;;  %s852_s15 = scalar_lea.sflag [#allocation6], %s841_s13 }
 0x25d   : > { %1233 = dma.done.wait (%p1011_p5), %s852_s15, 64  }
 0x25e   : > { %1235 = vsyncadd (%p1011_p5), %s852_s15, 4294967232  ;;  %s25_s12 = sadd.s32 1, %s1266_s12   ;;  %s1572_s18 = sld [smem:[#allocation10_spill]] }
 0x25f   : > { %p22_p6 = scmp.ge.s32.totalorder %s25_s12, 6   ;;  %s1573_s29 = sld [smem:[#allocation16_spill]] }
 0x260   : > { %s1574_s30 = sld [smem:[#allocation11_spill]]  ;;  %s1578_s27 = smov %s1242_s28 }
 0x261   : > { %s1575_s9 = sld [smem:[#allocation12_spill]]  ;;  %24 = sbr.rel (!%p22_p6) target bundleno = 7 (0x7), region = 112 }
 0x262   : > { %s1576_s10 = sld [smem:[#allocation13_spill]] }
 0x263   : > { %s1577_s11 = sld [smem:[#allocation14_spill]] }
 0x264   : > { %s1579_s28 = smov %s1572_s18 }
 0x266   :  { %858 = vsyncpa [#allocation4], 1 }
 0x267   :  { %860 = vsyncpa [#allocation4 + $0x1], 1 }
 0x268   :  { %861 = vsyncpa [#allocation6], 1 }
 0x269   :  { %863 = vsyncpa [#allocation6 + $0x1], 1 }

</bundles_post_ra>
